<compile_context>
chip_gen: v7x
topology: tpu7x:2x2x1
jax: 0.10.0
libtpu: 0.0.40
codegen_flags: <defaults>
</compile_context>

<pallas_src>
import functools

import jax
import jax.numpy as jnp
from jax.experimental import pallas as pl
from jax.experimental.pallas import tpu as pltpu


def _attn_kernel(x_ref, *refs, num_heads, has_mask):
    if has_mask:
        (mask_ref, wq_ref, wk_ref, wv_ref,
         bq_ref, bk_ref, bv_ref, wo_ref, bo_ref, o_ref) = refs
    else:
        mask_ref = None
        (wq_ref, wk_ref, wv_ref,
         bq_ref, bk_ref, bv_ref, wo_ref, bo_ref, o_ref) = refs

    x = x_ref[0]                                   # (S, E)
    S, E = x.shape
    H = num_heads
    mxu_dtype = x.dtype                            # bf16 in -> bf16 MXU inputs

    # Heads as a leading batch axis: broadcast x once so every einsum below is a
    # plain single-batch-dim dot_general.  No lane slicing, no lane concat.
    xh = jnp.broadcast_to(x[None], (H, S, E))

    # Per-head projections.  The 1/sqrt(head_dim) scale is already folded into
    # wq / bq by the wrapper.  f32 accumulation + f32 bias.
    q = jnp.einsum('hse,hed->hsd', xh, wq_ref[...],
                   preferred_element_type=jnp.float32) + bq_ref[...]
    k = jnp.einsum('hse,hed->hsd', xh, wk_ref[...],
                   preferred_element_type=jnp.float32) + bk_ref[...]
    v = jnp.einsum('hse,hed->hsd', xh, wv_ref[...],
                   preferred_element_type=jnp.float32) + bv_ref[...]

    scores = jnp.einsum('hqd,hkd->hqk',
                        q.astype(mxu_dtype), k.astype(mxu_dtype),
                        preferred_element_type=jnp.float32)       # (H, S, S)
    if has_mask:
        scores = scores + mask_ref[...]                           # (1,S,S) bcast over H

    # Numerically-stable softmax over the key axis.  The denominator inverse is
    # computed EXACTLY on the small (H, S, 1) tensor and applied after the P@V
    # matmul (cheaper than scaling the (H,S,S) probabilities; exact -> matches
    # the reference to float32 rounding).
    m = jnp.max(scores, axis=-1, keepdims=True)
    p = jnp.exp(scores - m)
    denom = jnp.sum(p, axis=-1, keepdims=True)
    inv_denom = 1.0 / denom                                       # exact, (H, S, 1)

    ctx = jnp.einsum('hqk,hkd->hqd',
                     p.astype(mxu_dtype), v.astype(mxu_dtype),
                     preferred_element_type=jnp.float32) * inv_denom   # (H, S, hd)

    # Output projection: head-batched (S,hd)@(hd,E), then a leading-axis sum --
    # replaces the lane concatenate + single (S,E)x(E,E) matmul.
    partial = jnp.einsum('hsd,hde->hse', ctx.astype(mxu_dtype), wo_ref[...],
                         preferred_element_type=jnp.float32)      # (H, S, E)
    out = jnp.sum(partial, axis=0) + bo_ref[...]                  # (S, E)
    o_ref[0] = out.astype(o_ref.dtype)


def sentence_aware_attention(x, in_proj_weight, in_proj_bias,
                             out_proj_weight, out_proj_bias,
                             num_heads, attn_mask=None):
    """Pallas implementation of SentenceAwareAttention.forward.

    x:              (B, S, E)
    in_proj_weight: (3E, E)   in_proj_bias: (3E,)
    out_proj_weight:(E, E)    out_proj_bias:(E,)
    attn_mask:      optional (B, S, S) additive float mask
    """
    B, S, E = x.shape
    assert E % num_heads == 0
    H = num_heads
    hd = E // H
    scale = 1.0 / (hd ** 0.5)
    param_dtype = x.dtype   # MXU inputs follow the activation dtype; f32 accumulation.

    # --- one-time weight prep (XLA ops outside the kernel) -------------------
    w = in_proj_weight.astype(jnp.float32)

    def to_heads(w2d):  # (E_out, E_in) -> W^T (E_in, E_out) -> (H, E_in, hd)
        return w2d.T.reshape(E, H, hd).transpose(1, 0, 2)

    wq_h = (to_heads(w[:E]) * scale).astype(param_dtype)      # softmax scale folded in
    wk_h = to_heads(w[E:2 * E]).astype(param_dtype)
    wv_h = to_heads(w[2 * E:]).astype(param_dtype)

    b = in_proj_bias.astype(jnp.float32)
    bq = (b[:E] * scale).reshape(H, 1, hd)
    bk = b[E:2 * E].reshape(H, 1, hd)
    bv = b[2 * E:].reshape(H, 1, hd)

    wo_h = out_proj_weight.T.astype(param_dtype).reshape(H, hd, E)  # rows h*hd:(h+1)*hd
    bo = out_proj_bias.astype(jnp.float32).reshape(1, E)

    has_mask = attn_mask is not None
    kernel = functools.partial(_attn_kernel, num_heads=H, has_mask=has_mask)

    in_specs = [pl.BlockSpec((1, S, E), lambda i: (i, 0, 0))]        # x
    args = [x]
    if has_mask:
        # Only stream the mask when one is actually provided: it is the largest
        # HBM stream in the kernel (B*S*S floats) -- never materialize zeros.
        in_specs.append(pl.BlockSpec((1, S, S), lambda i: (i, 0, 0)))
        args.append(attn_mask.astype(jnp.float32))

    in_specs += [
        pl.BlockSpec((H, E, hd), lambda i: (0, 0, 0)),   # wq (scaled)
        pl.BlockSpec((H, E, hd), lambda i: (0, 0, 0)),   # wk
        pl.BlockSpec((H, E, hd), lambda i: (0, 0, 0)),   # wv
        pl.BlockSpec((H, 1, hd), lambda i: (0, 0, 0)),   # bq (scaled)
        pl.BlockSpec((H, 1, hd), lambda i: (0, 0, 0)),   # bk
        pl.BlockSpec((H, 1, hd), lambda i: (0, 0, 0)),   # bv
        pl.BlockSpec((H, hd, E), lambda i: (0, 0, 0)),   # Wo, head-major rows
        pl.BlockSpec((1, E), lambda i: (0, 0)),          # bo
    ]
    args += [wq_h, wk_h, wv_h, bq, bk, bv, wo_h, bo]

    # TODO(synk): for long sequences (where the (S,S) scores / mask no longer fit
    # VMEM, esp. on v7x's 64 MiB), add a query-tile grid axis with an
    # online-softmax accumulator (flash-style) instead of the full-S block.
    return pl.pallas_call(
        kernel,
        out_shape=jax.ShapeDtypeStruct((B, S, E), x.dtype),
        grid_spec=pltpu.PrefetchScalarGridSpec(
            num_scalar_prefetch=0,
            grid=(B,),
            in_specs=in_specs,
            out_specs=pl.BlockSpec((1, S, E), lambda i: (i, 0, 0)),
        ),
        compiler_params=pltpu.CompilerParams(
            dimension_semantics=("parallel",)),
    )(*args)


def _reference(x, in_proj_weight, in_proj_bias, out_proj_weight, out_proj_bias,
               num_heads, attn_mask=None):
    """Pure-JAX reference mirroring torch.nn.MultiheadAttention (batch_first)."""
    B, S, E = x.shape
    hd = E // num_heads
    qkv = jnp.einsum("bse,fe->bsf", x, in_proj_weight) + in_proj_bias   # (B,S,3E)
    q, k, v = jnp.split(qkv, 3, axis=-1)

    def split_heads(t):  # (B,S,E) -> (B,H,S,hd)
        return t.reshape(B, S, num_heads, hd).transpose(0, 2, 1, 3)

    q, k, v = split_heads(q), split_heads(k), split_heads(v)
    scores = jnp.einsum("bhqd,bhkd->bhqk", q, k) / (hd ** 0.5)
    if attn_mask is not None:
        scores = scores + attn_mask[:, None, :, :]
    attn = jax.nn.softmax(scores, axis=-1)
    ctx = jnp.einsum("bhqk,bhkd->bhqd", attn, v)
    ctx = ctx.transpose(0, 2, 1, 3).reshape(B, S, E)
    return jnp.einsum("bse,fe->bsf", ctx, out_proj_weight) + out_proj_bias


if __name__ == "__main__":
    d_model, num_heads = 32, 4
    B, S = 2, 8

    key = jax.random.PRNGKey(0)
    k_x, k_w, k_b, k_ow, k_ob, k_m = jax.random.split(key, 6)

    x = jax.random.normal(k_x, (B, S, d_model), dtype=jnp.float32)

    # Deterministic parameter init (shapes per nn.MultiheadAttention.__init__).
    in_proj_weight = jax.random.normal(k_w, (3 * d_model, d_model), jnp.float32) * 0.1
    in_proj_bias = jax.random.normal(k_b, (3 * d_model,), jnp.float32) * 0.1
    out_proj_weight = jax.random.normal(k_ow, (d_model, d_model), jnp.float32) * 0.1
    out_proj_bias = jax.random.normal(k_ob, (d_model,), jnp.float32) * 0.1

    # Additive float attention mask (batch, sequence, sequence_mask).
    attn_mask = jax.random.normal(k_m, (B, S, S), jnp.float32) * 0.5

    out = sentence_aware_attention(
        x, in_proj_weight, in_proj_bias, out_proj_weight, out_proj_bias,
        num_heads, attn_mask=attn_mask)
    out = jax.block_until_ready(out)

    ref = _reference(
        x, in_proj_weight, in_proj_bias, out_proj_weight, out_proj_bias,
        num_heads, attn_mask=attn_mask)

    assert out.shape == (B, S, d_model)
    assert jnp.allclose(out, ref, atol=1e-4, rtol=1e-4), "mismatch vs reference (mask)"

    # attn_mask=None path: compiles a no-mask kernel variant (no zeros mask streamed).
    out_nomask = jax.block_until_ready(
        sentence_aware_attention(
            x, in_proj_weight, in_proj_bias, out_proj_weight, out_proj_bias,
            num_heads, attn_mask=None))
    ref_nomask = _reference(
        x, in_proj_weight, in_proj_bias, out_proj_weight, out_proj_bias,
        num_heads, attn_mask=None)
    assert jnp.allclose(out_nomask, ref_nomask, atol=1e-4, rtol=1e-4), \
        "mismatch vs reference (no mask)"

    print("KERNEL_OK")
</pallas_src>

<mosaic_0001>
module attributes {stable_mosaic.version = 11 : i64} {
  func.func @_attn_kernel(%arg0: i32, %arg1: memref<1x8x32xf32, #tpu.memory_space<vmem>>, %arg2: memref<1x8x8xf32, #tpu.memory_space<vmem>>, %arg3: memref<4x32x8xf32, #tpu.memory_space<vmem>>, %arg4: memref<4x32x8xf32, #tpu.memory_space<vmem>>, %arg5: memref<4x32x8xf32, #tpu.memory_space<vmem>>, %arg6: memref<4x1x8xf32, #tpu.memory_space<vmem>>, %arg7: memref<4x1x8xf32, #tpu.memory_space<vmem>>, %arg8: memref<4x1x8xf32, #tpu.memory_space<vmem>>, %arg9: memref<4x8x32xf32, #tpu.memory_space<vmem>>, %arg10: memref<1x32xf32, #tpu.memory_space<vmem>>, %arg11: memref<1x8x32xf32, #tpu.memory_space<vmem>>) attributes {dimension_semantics = [#tpu.dimension_semantics<parallel>], iteration_bounds = array<i64: 2>, scalar_prefetch = 0 : i64, scratch_operands = 0 : i64, tpu.core_type = #tpu.core_type<tc>, window_params = [{transform_indices = @transform_0, window_bounds = array<i64: 1, 8, 32>}, {transform_indices = @transform_1, window_bounds = array<i64: 1, 8, 8>}, {pipeline_mode = #tpu.pipeline_mode<synchronous>, transform_indices = @transform_2, window_bounds = array<i64: 4, 32, 8>}, {pipeline_mode = #tpu.pipeline_mode<synchronous>, transform_indices = @transform_3, window_bounds = array<i64: 4, 32, 8>}, {pipeline_mode = #tpu.pipeline_mode<synchronous>, transform_indices = @transform_4, window_bounds = array<i64: 4, 32, 8>}, {pipeline_mode = #tpu.pipeline_mode<synchronous>, transform_indices = @transform_5, window_bounds = array<i64: 4, 1, 8>}, {pipeline_mode = #tpu.pipeline_mode<synchronous>, transform_indices = @transform_6, window_bounds = array<i64: 4, 1, 8>}, {pipeline_mode = #tpu.pipeline_mode<synchronous>, transform_indices = @transform_7, window_bounds = array<i64: 4, 1, 8>}, {pipeline_mode = #tpu.pipeline_mode<synchronous>, transform_indices = @transform_8, window_bounds = array<i64: 4, 8, 32>}, {pipeline_mode = #tpu.pipeline_mode<synchronous>, transform_indices = @transform_9, window_bounds = array<i64: 1, 32>}, {transform_indices = @transform_10, window_bounds = array<i64: 1, 8, 32>}]} {
    %c0 = arith.constant 0 : index
    %c0_0 = arith.constant 0 : index
    %c0_1 = arith.constant 0 : index
    %0 = vector.load %arg1[%c0, %c0_0, %c0_1] : memref<1x8x32xf32, #tpu.memory_space<vmem>>, vector<1x8x32xf32>
    %1 = vector.shape_cast %0 : vector<1x8x32xf32> to vector<8x32xf32>
    %2 = vector.shape_cast %1 : vector<8x32xf32> to vector<1x8x32xf32>
    %3 = vector.shape_cast %2 : vector<1x8x32xf32> to vector<1x8x32xf32>
    %4 = vector.broadcast %3 : vector<1x8x32xf32> to vector<4x8x32xf32>
    %c0_2 = arith.constant 0 : index
    %c0_3 = arith.constant 0 : index
    %c0_4 = arith.constant 0 : index
    %5 = vector.load %arg3[%c0_2, %c0_3, %c0_4] : memref<4x32x8xf32, #tpu.memory_space<vmem>>, vector<4x32x8xf32>
    "tpu.trace_start"() <{level = 10 : i32, message = "hse,hed->hsd"}> : () -> ()
    %cst = arith.constant dense<0.000000e+00> : vector<4x8x8xf32>
    %6 = tpu.matmul %4, %5, %cst {dimension_numbers = #tpu.dot_dimension_numbers<[2], [1], [1], [2], [0, 0, 0, 1, 1, 2], [0], [0]>} : vector<4x8x32xf32>, vector<4x32x8xf32>, vector<4x8x8xf32> -> vector<4x8x8xf32>
    "tpu.trace_stop"() : () -> ()
    %c0_5 = arith.constant 0 : index
    %c0_6 = arith.constant 0 : index
    %c0_7 = arith.constant 0 : index
    %7 = vector.load %arg6[%c0_5, %c0_6, %c0_7] : memref<4x1x8xf32, #tpu.memory_space<vmem>>, vector<4x1x8xf32>
    %8 = vector.broadcast %7 : vector<4x1x8xf32> to vector<4x8x8xf32>
    %9 = arith.addf %6, %8 : vector<4x8x8xf32>
    %c0_8 = arith.constant 0 : index
    %c0_9 = arith.constant 0 : index
    %c0_10 = arith.constant 0 : index
    %10 = vector.load %arg4[%c0_8, %c0_9, %c0_10] : memref<4x32x8xf32, #tpu.memory_space<vmem>>, vector<4x32x8xf32>
    "tpu.trace_start"() <{level = 10 : i32, message = "hse,hed->hsd"}> : () -> ()
    %cst_11 = arith.constant dense<0.000000e+00> : vector<4x8x8xf32>
    %11 = tpu.matmul %4, %10, %cst_11 {dimension_numbers = #tpu.dot_dimension_numbers<[2], [1], [1], [2], [0, 0, 0, 1, 1, 2], [0], [0]>} : vector<4x8x32xf32>, vector<4x32x8xf32>, vector<4x8x8xf32> -> vector<4x8x8xf32>
    "tpu.trace_stop"() : () -> ()
    %c0_12 = arith.constant 0 : index
    %c0_13 = arith.constant 0 : index
    %c0_14 = arith.constant 0 : index
    %12 = vector.load %arg7[%c0_12, %c0_13, %c0_14] : memref<4x1x8xf32, #tpu.memory_space<vmem>>, vector<4x1x8xf32>
    %13 = vector.broadcast %12 : vector<4x1x8xf32> to vector<4x8x8xf32>
    %14 = arith.addf %11, %13 : vector<4x8x8xf32>
    %c0_15 = arith.constant 0 : index
    %c0_16 = arith.constant 0 : index
    %c0_17 = arith.constant 0 : index
    %15 = vector.load %arg5[%c0_15, %c0_16, %c0_17] : memref<4x32x8xf32, #tpu.memory_space<vmem>>, vector<4x32x8xf32>
    "tpu.trace_start"() <{level = 10 : i32, message = "hse,hed->hsd"}> : () -> ()
    %cst_18 = arith.constant dense<0.000000e+00> : vector<4x8x8xf32>
    %16 = tpu.matmul %4, %15, %cst_18 {dimension_numbers = #tpu.dot_dimension_numbers<[2], [1], [1], [2], [0, 0, 0, 1, 1, 2], [0], [0]>} : vector<4x8x32xf32>, vector<4x32x8xf32>, vector<4x8x8xf32> -> vector<4x8x8xf32>
    "tpu.trace_stop"() : () -> ()
    %c0_19 = arith.constant 0 : index
    %c0_20 = arith.constant 0 : index
    %c0_21 = arith.constant 0 : index
    %17 = vector.load %arg8[%c0_19, %c0_20, %c0_21] : memref<4x1x8xf32, #tpu.memory_space<vmem>>, vector<4x1x8xf32>
    %18 = vector.broadcast %17 : vector<4x1x8xf32> to vector<4x8x8xf32>
    %19 = arith.addf %16, %18 : vector<4x8x8xf32>
    "tpu.trace_start"() <{level = 10 : i32, message = "hqd,hkd->hqk"}> : () -> ()
    %cst_22 = arith.constant dense<0.000000e+00> : vector<4x8x8xf32>
    %20 = tpu.matmul %9, %14, %cst_22 {dimension_numbers = #tpu.dot_dimension_numbers<[2], [2], [1], [1], [0, 0, 0, 1, 1, 1], [0], [0]>} : vector<4x8x8xf32>, vector<4x8x8xf32>, vector<4x8x8xf32> -> vector<4x8x8xf32>
    "tpu.trace_stop"() : () -> ()
    %c0_23 = arith.constant 0 : index
    %c0_24 = arith.constant 0 : index
    %c0_25 = arith.constant 0 : index
    %21 = vector.load %arg2[%c0_23, %c0_24, %c0_25] : memref<1x8x8xf32, #tpu.memory_space<vmem>>, vector<1x8x8xf32>
    %22 = vector.broadcast %21 : vector<1x8x8xf32> to vector<4x8x8xf32>
    %23 = arith.addf %20, %22 : vector<4x8x8xf32>
    %cst_26 = arith.constant dense<0xFF800000> : vector<4x8xf32>
    %24 = vector.multi_reduction <maximumf>, %23, %cst_26 [2] : vector<4x8x8xf32> to vector<4x8xf32>
    %25 = vector.shape_cast %24 : vector<4x8xf32> to vector<4x8x1xf32>
    %26 = vector.broadcast %25 : vector<4x8x1xf32> to vector<4x8x8xf32>
    %27 = arith.subf %23, %26 : vector<4x8x8xf32>
    %28 = math.exp %27 : vector<4x8x8xf32>
    %cst_27 = arith.constant dense<0.000000e+00> : vector<4x8xf32>
    %29 = vector.multi_reduction <add>, %28, %cst_27 [2] : vector<4x8x8xf32> to vector<4x8xf32>
    %30 = vector.shape_cast %29 : vector<4x8xf32> to vector<4x8x1xf32>
    %cst_28 = arith.constant 1.000000e+00 : f32
    %31 = vector.broadcast %cst_28 : f32 to vector<4x8x1xf32>
    %32 = arith.divf %31, %30 : vector<4x8x1xf32>
    "tpu.trace_start"() <{level = 10 : i32, message = "hqk,hkd->hqd"}> : () -> ()
    %cst_29 = arith.constant dense<0.000000e+00> : vector<4x8x8xf32>
    %33 = tpu.matmul %28, %19, %cst_29 {dimension_numbers = #tpu.dot_dimension_numbers<[2], [1], [1], [2], [0, 0, 0, 1, 1, 2], [0], [0]>} : vector<4x8x8xf32>, vector<4x8x8xf32>, vector<4x8x8xf32> -> vector<4x8x8xf32>
    "tpu.trace_stop"() : () -> ()
    %34 = vector.broadcast %32 : vector<4x8x1xf32> to vector<4x8x8xf32>
    %35 = arith.mulf %33, %34 : vector<4x8x8xf32>
    %c0_30 = arith.constant 0 : index
    %c0_31 = arith.constant 0 : index
    %c0_32 = arith.constant 0 : index
    %36 = vector.load %arg9[%c0_30, %c0_31, %c0_32] : memref<4x8x32xf32, #tpu.memory_space<vmem>>, vector<4x8x32xf32>
    "tpu.trace_start"() <{level = 10 : i32, message = "hsd,hde->hse"}> : () -> ()
    %cst_33 = arith.constant dense<0.000000e+00> : vector<4x8x32xf32>
    %37 = tpu.matmul %35, %36, %cst_33 {dimension_numbers = #tpu.dot_dimension_numbers<[2], [1], [1], [2], [0, 0, 0, 1, 1, 2], [0], [0]>} : vector<4x8x8xf32>, vector<4x8x32xf32>, vector<4x8x32xf32> -> vector<4x8x32xf32>
    "tpu.trace_stop"() : () -> ()
    %cst_34 = arith.constant dense<0.000000e+00> : vector<8x32xf32>
    %38 = vector.multi_reduction <add>, %37, %cst_34 [0] : vector<4x8x32xf32> to vector<8x32xf32>
    %c0_35 = arith.constant 0 : index
    %c0_36 = arith.constant 0 : index
    %39 = vector.load %arg10[%c0_35, %c0_36] : memref<1x32xf32, #tpu.memory_space<vmem>>, vector<1x32xf32>
    %40 = vector.broadcast %39 : vector<1x32xf32> to vector<8x32xf32>
    %41 = arith.addf %38, %40 : vector<8x32xf32>
    %c0_37 = arith.constant 0 : index
    %c0_38 = arith.constant 0 : index
    %c0_39 = arith.constant 0 : index
    %42 = vector.load %arg11[%c0_37, %c0_38, %c0_39] : memref<1x8x32xf32, #tpu.memory_space<vmem>>, vector<1x8x32xf32>
    %43 = vector.shape_cast %42 : vector<1x8x32xf32> to vector<8x32xf32>
    %44 = vector.shape_cast %41 : vector<8x32xf32> to vector<1x8x32xf32>
    tpu.vector_store %arg11[%c0_37, %c0_38, %c0_39], %44 {strides = array<i32>} : memref<1x8x32xf32, #tpu.memory_space<vmem>>, vector<1x8x32xf32>,
    return
  }
  func.func @transform_0(%arg0: i32) -> (i32, i32, i32) {
    %c0_i32 = arith.constant 0 : i32
    %c0_i32_0 = arith.constant 0 : i32
    %c0_i32_1 = arith.constant 0 : i32
    return %arg0, %c0_i32, %c0_i32_0 : i32, i32, i32
  }
  func.func @transform_1(%arg0: i32) -> (i32, i32, i32) {
    %c0_i32 = arith.constant 0 : i32
    %c0_i32_0 = arith.constant 0 : i32
    %c0_i32_1 = arith.constant 0 : i32
    return %arg0, %c0_i32, %c0_i32_0 : i32, i32, i32
  }
  func.func @transform_2(%arg0: i32) -> (i32, i32, i32) {
    %c0_i32 = arith.constant 0 : i32
    %c0_i32_0 = arith.constant 0 : i32
    %c0_i32_1 = arith.constant 0 : i32
    %c0_i32_2 = arith.constant 0 : i32
    return %c0_i32, %c0_i32_0, %c0_i32_1 : i32, i32, i32
  }
  func.func @transform_3(%arg0: i32) -> (i32, i32, i32) {
    %c0_i32 = arith.constant 0 : i32
    %c0_i32_0 = arith.constant 0 : i32
    %c0_i32_1 = arith.constant 0 : i32
    %c0_i32_2 = arith.constant 0 : i32
    return %c0_i32, %c0_i32_0, %c0_i32_1 : i32, i32, i32
  }
  func.func @transform_4(%arg0: i32) -> (i32, i32, i32) {
    %c0_i32 = arith.constant 0 : i32
    %c0_i32_0 = arith.constant 0 : i32
    %c0_i32_1 = arith.constant 0 : i32
    %c0_i32_2 = arith.constant 0 : i32
    return %c0_i32, %c0_i32_0, %c0_i32_1 : i32, i32, i32
  }
  func.func @transform_5(%arg0: i32) -> (i32, i32, i32) {
    %c0_i32 = arith.constant 0 : i32
    %c0_i32_0 = arith.constant 0 : i32
    %c0_i32_1 = arith.constant 0 : i32
    %c0_i32_2 = arith.constant 0 : i32
    return %c0_i32, %c0_i32_0, %c0_i32_1 : i32, i32, i32
  }
  func.func @transform_6(%arg0: i32) -> (i32, i32, i32) {
    %c0_i32 = arith.constant 0 : i32
    %c0_i32_0 = arith.constant 0 : i32
    %c0_i32_1 = arith.constant 0 : i32
    %c0_i32_2 = arith.constant 0 : i32
    return %c0_i32, %c0_i32_0, %c0_i32_1 : i32, i32, i32
  }
  func.func @transform_7(%arg0: i32) -> (i32, i32, i32) {
    %c0_i32 = arith.constant 0 : i32
    %c0_i32_0 = arith.constant 0 : i32
    %c0_i32_1 = arith.constant 0 : i32
    %c0_i32_2 = arith.constant 0 : i32
    return %c0_i32, %c0_i32_0, %c0_i32_1 : i32, i32, i32
  }
  func.func @transform_8(%arg0: i32) -> (i32, i32, i32) {
    %c0_i32 = arith.constant 0 : i32
    %c0_i32_0 = arith.constant 0 : i32
    %c0_i32_1 = arith.constant 0 : i32
    %c0_i32_2 = arith.constant 0 : i32
    return %c0_i32, %c0_i32_0, %c0_i32_1 : i32, i32, i32
  }
  func.func @transform_9(%arg0: i32) -> (i32, i32) {
    %c0_i32 = arith.constant 0 : i32
    %c0_i32_0 = arith.constant 0 : i32
    %c0_i32_1 = arith.constant 0 : i32
    return %c0_i32, %c0_i32_0 : i32, i32
  }
  func.func @transform_10(%arg0: i32) -> (i32, i32, i32) {
    %c0_i32 = arith.constant 0 : i32
    %c0_i32_0 = arith.constant 0 : i32
    %c0_i32_1 = arith.constant 0 : i32
    return %arg0, %c0_i32, %c0_i32_0 : i32, i32, i32
  }
}

</mosaic_0001>

<bundles_post_ra>
// kernel: tpu_custom_call.1
= control target key start
LH: loop header
LB: loop body
LE: loop exit
PB: predicated region body
PF: predicated region fallthrough
CT: control target
= control target key end

     0   :  { %15 = vsyncpa [#allocation3], 0  ;;  %s3417_s0 = inlined_call_operand.vmem [shape: f32[2,8,32], index: 0, kind: input, shape index: {}]   ;;  %s3418_s1 = inlined_call_operand.vmem [shape: f32[2,8,8], index: 1, kind: input, shape index: {}]   ;;  %s3419_s2 = inlined_call_operand.vmem [shape: f32[4,32,8], index: 2, kind: input, shape index: {}]   ;;  %s3420_s3 = inlined_call_operand.vmem [shape: f32[4,32,8], index: 3, kind: input, shape index: {}]   ;;  %s3421_s4 = inlined_call_operand.vmem [shape: f32[4,32,8], index: 4, kind: input, shape index: {}]   ;;  %s3422_s5 = inlined_call_operand.vmem [shape: f32[4,1,8], index: 5, kind: input, shape index: {}]   ;;  %s3423_s6 = inlined_call_operand.vmem [shape: f32[4,1,8], index: 6, kind: input, shape index: {}]   ;;  %s3424_s7 = inlined_call_operand.vmem [shape: f32[4,1,8], index: 7, kind: input, shape index: {}]   ;;  %s3425_s8 = inlined_call_operand.vmem [shape: f32[4,8,32], index: 8, kind: input, shape index: {}]   ;;  %s3426_s9 = inlined_call_operand.vmem [shape: f32[1,32], index: 9, kind: input, shape index: {}]   ;;  %s3427_s10 = inlined_call_operand.hbm [shape: f32[2,8,32], index: 10, kind: output, shape index: {}]  }
   0x1   :  { %17 = vsyncpa [#allocation3 + $0x1], 0  ;;  %s2973_s13 = smov 0   ;;  %s2975_s14 = smov 0  }
   0x2   :  { %s2977_s15 = smov 0   ;;  %s2979_s16 = smov 0  }
   0x3 LB: > { %s2994_s17 = sadd.s32 4294967295, %s2912_s16   ;;  %s2392_s18 = sadd.s32 4294967294, %s2912_s16   ;;  %s2912_s16 = sphi %s2979_s16, %s3435_s16   ;;  %s2908_s15 = sphi %s2977_s15, %s3434_s15   ;;  %s2904_s14 = sphi %s2975_s14, %s3433_s14   ;;  %s2900_s13 = sphi %s2973_s13, %s3432_s13  }
   0x4   : > { %s2998_s19 = sadd.s32 1, %s2912_s16   ;;  %s250_s20 = sadd.s32 1, %s2908_s15 }
   0x5   : > { %s247_s21 = ssub.s32 %s2912_s16, %s2998_s19  ;;  %p260_p0 = scmp.ne.s32.totalorder %s2908_s15, %s2904_s14 }
   0x6   : > { %p248_p1 = scmp.eq.s32.totalorder %s247_s21, 0  ;;  %p261_p2 = scmp.eq.s32.totalorder %s2994_s17, 1 }
   0x7   : > { %p266_p3 = scmp.ne.s32.totalorder %s2904_s14, %s2900_s13  ;;  %p267_p4 = scmp.eq.s32.totalorder %s2392_s18, 1 }
   0x8   : > { %s3009_s22 = scalar_select %p248_p1, %s2908_s15, %s250_s20  }
   0x9   : > { %p3011_p5 = por %p261_p2, %p260_p0  ;;  %p3015_p6 = por %p267_p4, %p266_p3 }
   0xa   : > { %3428 = sst [smem:[#allocation5_spill]] %s3009_s22  ;;  %p2395_p7 = scmp.ge.s32.totalorder %s2912_s16, 1 }
   0xb   : > { %p323_p8 = scmp.lt.s32.totalorder %s2912_s16, 3 }
   0xd   : > { %p324_p9 = pnand %p2395_p7, %p323_p8 }
   0xe   : > { %v373_v0 = vld [vmem:[%s3419_s2] sm:$0xff] (!%p324_p9)  ;;  %v374_v1 = vld [vmem:[%s3419_s2 + $0x8] sm:$0xff] (!%p324_p9)  ;;  %v2914_v3 = vmov (!%p324_p9), 0.0|0.0   ;;  %v375_v6 = vld [vmem:[%s3419_s2 + $0x10] sm:$0xff] (!%p324_p9)  ;;  %p364_p10 = scmp.lt.s32.totalorder (!%p324_p9), %s2994_s17, 1  ;;  %vm2915_vm0 = vmmov (!%p324_p9), 0  }
   0xf   : > { %327 = sbr.rel (%p324_p9) target bundleno = 1089 (0x441), region = 60  ;;  %v377_v2 = vld [vmem:[%s3419_s2 + $0x20] sm:$0xff] (!%p324_p9)  ;;  %2720 = vmatprep.subr.bf16.mxu0 (!%p324_p9), %v2914_v3  ;;  %2726 = vmatprep.subr.bf16.mxu1 (!%p324_p9), %v2914_v3  ;;  %v2721_v4 = vpack.c.bf16 (!%p324_p9), %v374_v1, %v373_v0  ;;  %v378_v5 = vld [vmem:[%s3419_s2 + $0x28] sm:$0xff] (!%p324_p9)  ;;  %v376_v7 = vld [vmem:[%s3419_s2 + $0x18] sm:$0xff] (!%p324_p9)  ;;  %v2916_v11 = vmov (!%p324_p9), 0.0   ;;  %vm417_vm1 = vcmask (!%p324_p9), 261120  }
  0x10   : > { %v2727_v8 = vpack.c.bf16 (!%p324_p9), %v378_v5, %v377_v2  ;;  %v379_v9 = vld [vmem:[%s3419_s2 + $0x30] sm:$0xff] (!%p324_p9)  ;;  %v380_v10 = vld [vmem:[%s3419_s2 + $0x38] sm:$0xff] (!%p324_p9)  ;;  %2536 = vmatprep.mubr.msk.f32.mxu0 (!%p324_p9), %vm2915_vm0, %v2916_v11  ;;  %2547 = vmatprep.mubr.msk.f32.mxu1 (!%p324_p9), %vm2915_vm0, %v2916_v11  ;;  %v2724_v12 = vpack.c.bf16 (!%p324_p9), %v376_v7, %v375_v6  ;;  %v381_v14 = vld [vmem:[%s3419_s2 + $0x40] sm:$0xff] (!%p324_p9)  ;;  %vm1350_vm2 = vcmask (!%p324_p9), 64512   ;;  %s2441_s28 = sshll.u32 (!%p324_p9), %s2994_s17, 7 }
  0x11   : > { %2722 = vmatpush3.bf16.msra.mxu0 (!%p324_p9), %v2721_v4  ;;  %v2730_v13 = vpack.c.bf16 (!%p324_p9), %v380_v10, %v379_v9  ;;  %v382_v15 = vld [vmem:[%s3419_s2 + $0x48] sm:$0xff] (!%p324_p9)  ;;  %v385_v16 = vld [vmem:[%s3419_s2 + $0x60] sm:$0xff] (!%p324_p9)  ;;  %v383_v21 = vld [vmem:[%s3419_s2 + $0x50] sm:$0xff] (!%p324_p9)  ;;  %s3374_s20 = scalar_lea.hbm (!%p324_p9), %s3427_s10, %s2441_s28 }
  0x12   : > { %2728 = vmatpush3.bf16.msra.mxu1 (!%p324_p9), %v2727_v8  ;;  %2723 = vmatprep.subr.bf16.mxu0 (!%p324_p9), %v2914_v3  ;;  %v386_v17 = vld [vmem:[%s3419_s2 + $0x68] sm:$0xff] (!%p324_p9)  ;;  %v2733_v19 = vpack.c.bf16 (!%p324_p9), %v382_v15, %v381_v14  ;;  %v384_v22 = vld [vmem:[%s3419_s2 + $0x58] sm:$0xff] (!%p324_p9)  ;;  %v387_v23 = vld [vmem:[%s3419_s2 + $0x70] sm:$0xff] (!%p324_p9) }
  0x13   : > { %2729 = vmatprep.subr.bf16.mxu1 (!%p324_p9), %v2914_v3  ;;  %v2739_v20 = vpack.c.bf16 (!%p324_p9), %v386_v17, %v385_v16  ;;  %v388_v24 = vld [vmem:[%s3419_s2 + $0x78] sm:$0xff] (!%p324_p9)  ;;  %v2736_v25 = vpack.c.bf16 (!%p324_p9), %v384_v22, %v383_v21  ;;  %v701_v27 = vld [vmem:[%s3420_s3] sm:$0xff] (!%p324_p9)  ;;  %v702_v28 = vld [vmem:[%s3420_s3 + $0x8] sm:$0xff] (!%p324_p9) }
  0x14   : > { %v2742_v26 = vpack.c.bf16 (!%p324_p9), %v388_v24, %v387_v23  ;;  %v705_v29 = vld [vmem:[%s3420_s3 + $0x20] sm:$0xff] (!%p324_p9)  ;;  %v706_v30 = vld [vmem:[%s3420_s3 + $0x28] sm:$0xff] (!%p324_p9)  ;;  %v2745_v31 = vpack.c.bf16 (!%p324_p9), %v702_v28, %v701_v27  ;;  %v703_v33 = vld [vmem:[%s3420_s3 + $0x10] sm:$0xff] (!%p324_p9) }
  0x15   : > { %2725 = vmatpush3.bf16.msra.mxu0 (!%p324_p9), %v2724_v12  ;;  %v2751_v32 = vpack.c.bf16 (!%p324_p9), %v706_v30, %v705_v29  ;;  %v704_v34 = vld [vmem:[%s3420_s3 + $0x18] sm:$0xff] (!%p324_p9)  ;;  %v707_v35 = vld [vmem:[%s3420_s3 + $0x30] sm:$0xff] (!%p324_p9)  ;;  %v709_v39 = vld [vmem:[%s3420_s3 + $0x40] sm:$0xff] (!%p324_p9) }
  0x16   : > { %s3053_s30 = scalar_select %p364_p10, %s2994_s17, 1  ;;  %2731 = vmatpush3.bf16.msra.mxu1 %v2730_v13  ;;  %2732 = vmatprep.subr.bf16.mxu0 %v2914_v3  ;;  %v708_v36 = vld [vmem:[%s3420_s3 + $0x38] sm:$0xff]  ;;  %v2748_v37 = vpack.c.bf16 %v704_v34, %v703_v33  ;;  %v710_v40 = vld [vmem:[%s3420_s3 + $0x48] sm:$0xff]  ;;  %v713_v41 = vld [vmem:[%s3420_s3 + $0x60] sm:$0xff] }
  0x17   : > { %2738 = vmatprep.subr.bf16.mxu1 %v2914_v3  ;;  %v2754_v38 = vpack.c.bf16 %v708_v36, %v707_v35  ;;  %v714_v42 = vld [vmem:[%s3420_s3 + $0x68] sm:$0xff]  ;;  %v2757_v43 = vpack.c.bf16 %v710_v40, %v709_v39  ;;  %v711_v45 = vld [vmem:[%s3420_s3 + $0x50] sm:$0xff]  ;;  %v712_v46 = vld [vmem:[%s3420_s3 + $0x58] sm:$0xff]  ;;  %s2917_s17 = smov [#allocation2]  }
  0x18   : > { %s2397_s21 = sshll.u32 %s3053_s30, 3  ;;  %v2763_v44 = vpack.c.bf16 %v714_v42, %v713_v41  ;;  %v715_v47 = vld [vmem:[%s3420_s3 + $0x70] sm:$0xff]  ;;  %v716_v48 = vld [vmem:[%s3420_s3 + $0x78] sm:$0xff]  ;;  %v2760_v49 = vpack.c.bf16 %v712_v46, %v711_v45  ;;  %v1025_v51 = vld [vmem:[%s3421_s4] sm:$0xff]  ;;  %s361_s30 = sand.u32 1, %s2904_s14  }
  0x19   : > { %s367_s11 = scalar_lea.vmem %s3417_s0, %s2397_s21  ;;  %v2766_v50 = vpack.c.bf16 %v716_v48, %v715_v47  ;;  %v1026_v52 = vld [vmem:[%s3421_s4 + $0x8] sm:$0xff]  ;;  %v1029_v53 = vld [vmem:[%s3421_s4 + $0x20] sm:$0xff]  ;;  %v1027_v57 = vld [vmem:[%s3421_s4 + $0x10] sm:$0xff]  ;;  %s371_s22 = scalar_lea.vmem %s3418_s1, %s2397_s21 }
  0x1a   : > { %v3075_v18 = vld [vmem:[%s367_s11] sm:$0xff]  ;;  %v1030_v54 = vld [vmem:[%s3421_s4 + $0x28] sm:$0xff]  ;;  %v2769_v55 = vpack.c.bf16 %v1026_v52, %v1025_v51  ;;  %v1028_v58 = vld [vmem:[%s3421_s4 + $0x18] sm:$0xff]  ;;  %s2396_s21 = sshll.u32 %s361_s30, 3  ;;  %s2308_s25 = scalar_lea.sflag [#allocation3], %s361_s30 }
  0x1b   : > { %2537 = vmatmul.mubr.msk.f32.vlgmr.msra.gmra.mrb[0].mxu0 %vm417_vm1, %v3075_v18  ;;  %2548 = vmatmul.mubr.msk.f32.vlgmr.msra.gmra.mrb[0].mxu1 %vm417_vm1, %v3075_v18  ;;  %v2775_v56 = vpack.c.bf16 %v1030_v54, %v1029_v53  ;;  %v1031_v59 = vld [vmem:[%s3421_s4 + $0x30] sm:$0xff]  ;;  %v2772_v60 = vpack.c.bf16 %v1028_v58, %v1027_v57  ;;  %v1032_v61 = vld [vmem:[%s3421_s4 + $0x38] sm:$0xff]  ;;  %v1033_v63 = vld [vmem:[%s3421_s4 + $0x40] sm:$0xff]  ;;  %s363_s29 = scalar_lea.vmem [#allocation2], %s2396_s21  ;;  %s2854_s21 = sshll.u32 %s2917_s17, 4  ;;  %s2855_s21 = int_to_ptr.vmem [resolvable:$false] %s2854_s21 }
  0x1c   : > { %2734 = vmatpush3.bf16.msra.mxu0 %v2733_v19  ;;  %2740 = vmatpush3.bf16.msra.mxu1 %v2739_v20  ;;  %v2778_v62 = vpack.c.bf16 %v1032_v61, %v1031_v59  ;;  %v1034_v0 = vld [vmem:[%s3421_s4 + $0x48] sm:$0xff]  ;;  %v1037_v1 = vld [vmem:[%s3421_s4 + $0x60] sm:$0xff]  ;;  %v1035_v6 = vld [vmem:[%s3421_s4 + $0x50] sm:$0xff]  ;;  %s2321_s11 = sshll.u32 %s363_s29, 4  ;;  %s2856_s26 = scalar_lea.vmem %s2855_s21, 256  ;;  %s3376_s11 = int_to_ptr.vmem [resolvable:$true] %s2321_s11 }
  0x1d   : > { %2735 = vmatprep.subr.bf16.mxu0 %v2914_v3  ;;  %2741 = vmatprep.subr.bf16.mxu1 %v2914_v3  ;;  %v2781_v2 = vpack.c.bf16 %v1034_v0, %v1033_v63  ;;  %v1038_v4 = vld [vmem:[%s3421_s4 + $0x68] sm:$0xff]  ;;  %v1036_v7 = vld [vmem:[%s3421_s4 + $0x58] sm:$0xff]  ;;  %v1039_v8 = vld [vmem:[%s3421_s4 + $0x70] sm:$0xff]  ;;  %p2857_p0 = scmp.lt.s32.totalorder %s3376_s11, %s2855_s21 }
  0x1e   : > { %2558 = vmatprep.mubr.msk.f32.mxu0 %vm2915_vm0, %v2916_v11  ;;  %2569 = vmatprep.mubr.msk.f32.mxu1 %vm2915_vm0, %v2916_v11  ;;  %v2787_v5 = vpack.c.bf16 %v1038_v4, %v1037_v1  ;;  %v2784_v9 = vpack.c.bf16 %v1036_v7, %v1035_v6  ;;  %v1040_v10 = vld [vmem:[%s3421_s4 + $0x78] sm:$0xff]  ;;  %v2407_v21 = vld [vmem:[%s3423_s6] ss:$0 sm:$0xff]  ;;  %v2400_v27 = vld [vmem:[%s3422_s5 + $0x1] ss:$0 sm:$0xff] }
  0x1f   : > { %v2790_v12 = vpack.c.bf16 %v1040_v10, %v1039_v8  ;;  %v2399_v23 = vld [vmem:[%s3422_s5] ss:$0 sm:$0xff]  ;;  %v2410_v33 = vld [vmem:[%s3423_s6 + $0x3] ss:$0 sm:$0xff]  ;;  %v2401_v35 = vld [vmem:[%s3422_s5 + $0x2] ss:$0 sm:$0xff] }
  0x20   : > { %2737 = vmatpush3.bf16.msra.mxu0 %v2736_v25  ;;  %2743 = vmatpush3.bf16.msra.mxu1 %v2742_v26  ;;  %v2402_v39 = vld [vmem:[%s3422_s5 + $0x3] ss:$0 sm:$0xff]  ;;  %v2416_v45 = vld [vmem:[%s3424_s7 + $0x1] ss:$0 sm:$0xff] }
  0x21   : > { %2744 = vmatprep.subr.bf16.mxu0 %v2914_v3  ;;  %2750 = vmatprep.subr.bf16.mxu1 %v2914_v3 }
  0x23   : > { %2559 = vmatmul.mubr.msk.f32.vlgmr.msra.gmra.mrb[2].mxu0 %vm417_vm1, %v3075_v18  ;;  %2570 = vmatmul.mubr.msk.f32.vlgmr.msra.gmra.mrb[2].mxu1 %vm417_vm1, %v3075_v18 }
  0x24   : > { %2746 = vmatpush3.bf16.msra.mxu0 %v2745_v31  ;;  %2752 = vmatpush3.bf16.msra.mxu1 %v2751_v32  ;;  %v2409_v32 = vld [vmem:[%s3423_s6 + $0x2] ss:$0 sm:$0xff] }
  0x25   : > { %2747 = vmatprep.subr.bf16.mxu0 %v2914_v3  ;;  %2753 = vmatprep.subr.bf16.mxu1 %v2914_v3 }
  0x26   : > { %2580 = vmatprep.mubr.msk.f32.mxu0 %vm2915_vm0, %v2916_v11  ;;  %2591 = vmatprep.mubr.msk.f32.mxu1 %vm2915_vm0, %v2916_v11 }
  0x28   : > { %2749 = vmatpush3.bf16.msra.mxu0 %v2748_v37  ;;  %2755 = vmatpush3.bf16.msra.mxu1 %v2754_v38 }
  0x29   : > { %2756 = vmatprep.subr.bf16.mxu0 %v2914_v3  ;;  %2762 = vmatprep.subr.bf16.mxu1 %v2914_v3 }
  0x2b   : > { %2581 = vmatmul.mubr.msk.f32.vlgmr.msra.gmra.mrb[4].mxu0 %vm417_vm1, %v3075_v18  ;;  %2592 = vmatmul.mubr.msk.f32.vlgmr.msra.gmra.mrb[4].mxu1 %vm417_vm1, %v3075_v18 }
  0x2c   : > { %2758 = vmatpush3.bf16.msra.mxu0 %v2757_v43  ;;  %2764 = vmatpush3.bf16.msra.mxu1 %v2763_v44  ;;  %v2415_v44 = vld [vmem:[%s3424_s7] ss:$0 sm:$0xff] }
  0x2d   : > { %2759 = vmatprep.subr.bf16.mxu0 %v2914_v3  ;;  %2765 = vmatprep.subr.bf16.mxu1 %v2914_v3 }
  0x2e   : > { %2602 = vmatprep.mubr.msk.f32.mxu0 %vm2915_vm0, %v2916_v11  ;;  %2613 = vmatprep.mubr.msk.f32.mxu1 %vm2915_vm0, %v2916_v11 }
  0x30   : > { %2761 = vmatpush3.bf16.msra.mxu0 %v2760_v49  ;;  %2767 = vmatpush3.bf16.msra.mxu1 %v2766_v50 }
  0x31   : > { %2768 = vmatprep.subr.bf16.mxu0 %v2914_v3  ;;  %2774 = vmatprep.subr.bf16.mxu1 %v2914_v3 }
  0x33   : > { %2603 = vmatmul.mubr.msk.f32.vlgmr.msra.gmra.mrb[6].mxu0 %vm417_vm1, %v3075_v18  ;;  %2614 = vmatmul.mubr.msk.f32.vlgmr.msra.gmra.mrb[6].mxu1 %vm417_vm1, %v3075_v18 }
  0x34   : > { %2770 = vmatpush3.bf16.msra.mxu0 %v2769_v55  ;;  %2776 = vmatpush3.bf16.msra.mxu1 %v2775_v56  ;;  %v1349_v56 = vld [vmem:[%s371_s22] sm:$0xff]  ;;  %s2850_s22 = scalar_lea.vmem %s3376_s11, 128 }
  0x35   : > { %2771 = vmatprep.subr.bf16.mxu0 %v2914_v3  ;;  %2777 = vmatprep.subr.bf16.mxu1 %v2914_v3  ;;  %p2851_p11 = scmp.ne.s32.totalorder %s3376_s11, %s2850_s22  ;;  %p2858_p1 = scmp.lt.s32.totalorder %s2856_s26, %s2850_s22 }
  0x36   : > { %2624 = vmatprep.mubr.msk.f32.mxu0 %vm2915_vm0, %v2916_v11  ;;  %2635 = vmatprep.mubr.msk.f32.mxu1 %vm2915_vm0, %v2916_v11 }
  0x37   : > { %p2852_p12 = pnand %p2851_p11, %p3011_p5  ;;  %p2859_p2 = por %p2858_p1, %p2857_p0 }
  0x38   : > { %2773 = vmatpush3.bf16.msra.mxu0 %v2772_v60  ;;  %2779 = vmatpush3.bf16.msra.mxu1 %v2778_v62 }
  0x39   : > { %2780 = vmatprep.subr.bf16.mxu0 %v2914_v3  ;;  %2786 = vmatprep.subr.bf16.mxu1 %v2914_v3  ;;  %p2853_p13 = pneg %p2852_p12 }
  0x3b   : > { %2625 = vmatmul.mubr.msk.f32.vlgmr.msra.gmra.mrb[8].mxu0 %vm417_vm1, %v3075_v18  ;;  %2636 = vmatmul.mubr.msk.f32.vlgmr.msra.gmra.mrb[8].mxu1 %vm417_vm1, %v3075_v18  ;;  %p2860_p3 = pnand %p2859_p2, %p2853_p13 }
  0x3c   : > { %2782 = vmatpush3.bf16.msra.mxu0 %v2781_v2  ;;  %2788 = vmatpush3.bf16.msra.mxu1 %v2787_v5 }
  0x3d   : > { %2783 = vmatprep.subr.bf16.mxu0 %v2914_v3  ;;  %2789 = vmatprep.subr.bf16.mxu1 %v2914_v3 }
  0x3e   : > { %2646 = vmatprep.mubr.msk.f32.mxu0 %vm2915_vm0, %v2916_v11  ;;  %2657 = vmatprep.mubr.msk.f32.mxu1 %vm2915_vm0, %v2916_v11 }
  0x40   : > { %2785 = vmatpush3.bf16.msra.mxu0 %v2784_v9  ;;  %2791 = vmatpush3.bf16.msra.mxu1 %v2790_v12 }
  0x41   : > { %2660 = vmatprep.subr.mxu0 %v2916_v11  ;;  %2665 = vmatprep.subr.mxu1 %v2916_v11 }
  0x43   : > { %2647 = vmatmul.mubr.msk.f32.vlgmr.msra.gmra.mrb[10].mxu0 %vm417_vm1, %v3075_v18  ;;  %2658 = vmatmul.mubr.msk.f32.vlgmr.msra.gmra.mrb[10].mxu1 %vm417_vm1, %v3075_v18  ;;  %v2408_v18 = vld [vmem:[%s3423_s6 + $0x1] ss:$0 sm:$0xff] }
  0x44   : > { %2662 = vmatprep.mubr.msk.f32.mxu0 %vm2915_vm0, %v2916_v11  ;;  %2667 = vmatprep.mubr.msk.f32.mxu1 %vm2915_vm0, %v2916_v11 }
  0xee   : > { %v487_v3 = vpop.f32.mrb[0].mxu0  ;;  %v557_v14 = vpop.f32.mrb[0].mxu1 }
  0xef   : > { %v2538_v13 = vpop.f32.mrb[1].mxu0  ;;  %v2549_v15 = vpop.f32.mrb[1].mxu1  ;;  %v488_v30 = vadd.f32 %v2399_v23, %v487_v3  ;;  %v558_v31 = vadd.f32 %v2400_v27, %v557_v14 }
  0xf6   : > { %v627_v16 = vpop.f32.mrb[2].mxu0  ;;  %v697_v19 = vpop.f32.mrb[2].mxu1 }
  0xf7   : > { %v2560_v17 = vpop.f32.mrb[3].mxu0  ;;  %v2571_v20 = vpop.f32.mrb[3].mxu1  ;;  %v628_v42 = vadd.f32 %v2401_v35, %v627_v16  ;;  %v698_v43 = vadd.f32 %v2402_v39, %v697_v19  ;;  %v1996_v35 = vld [vmem:[%s3425_s8 + $0x8] sm:$0xff] }
  0xf8   : > { %v2417_v20 = vld [vmem:[%s3424_s7 + $0x2] ss:$0 sm:$0xff] }
  0xfe   : > { %v811_v22 = vpop.f32.mrb[4].mxu0  ;;  %v881_v25 = vpop.f32.mrb[4].mxu1 }
  0xff   : > { %v812_v24 = vadd.f32 %v2407_v21, %v811_v22  ;;  %v2582_v26 = vpop.f32.mrb[5].mxu0  ;;  %v882_v28 = vadd.f32 %v2408_v18, %v881_v25  ;;  %v2593_v29 = vpop.f32.mrb[5].mxu1  ;;  %v2418_v25 = vld [vmem:[%s3424_s7 + $0x3] ss:$0 sm:$0xff] }
 0x101   : > { %2661 = vmatpush3.xpose.msk.msra.mxu0 %vm1350_vm2, %v812_v24  ;;  %2666 = vmatpush3.xpose.msk.msra.mxu1 %vm1350_vm2, %v882_v28 }
 0x102   : > { %2670 = vmatprep.subr.mxu0 %v2916_v11  ;;  %2675 = vmatprep.subr.mxu1 %v2916_v11 }
 0x104   : > { %2663 = vmatmul.mubr.msk.f32.vlgmr.msra.gmra.mrb[12].mxu0 %vm1350_vm2, %v488_v30  ;;  %2668 = vmatmul.mubr.msk.f32.vlgmr.msra.gmra.mrb[12].mxu1 %vm1350_vm2, %v558_v31 }
 0x105   : > { %2672 = vmatprep.mubr.msk.f32.mxu0 %vm2915_vm0, %v2916_v11  ;;  %2677 = vmatprep.mubr.msk.f32.mxu1 %vm2915_vm0, %v2916_v11 }
 0x106   : > { %v951_v34 = vpop.f32.mrb[6].mxu0  ;;  %v1021_v37 = vpop.f32.mrb[6].mxu1 }
 0x107   : > { %v952_v36 = vadd.f32 %v2409_v32, %v951_v34  ;;  %v2604_v38 = vpop.f32.mrb[7].mxu0  ;;  %v1022_v40 = vadd.f32 %v2410_v33, %v1021_v37  ;;  %v2615_v41 = vpop.f32.mrb[7].mxu1  ;;  %v1995_v34 = vld [vmem:[%s3425_s8] sm:$0xff] }
 0x109   : > { %2671 = vmatpush3.xpose.msk.msra.mxu0 %vm1350_vm2, %v952_v36  ;;  %2676 = vmatpush3.xpose.msk.msra.mxu1 %vm1350_vm2, %v1022_v40 }
 0x10a   : > { %2680 = vmatprep.subr.mxu0 %v2916_v11  ;;  %2685 = vmatprep.subr.mxu1 %v2916_v11 }
 0x10c   : > { %2673 = vmatmul.mubr.msk.f32.vlgmr.msra.gmra.mrb[14].mxu0 %vm1350_vm2, %v628_v42  ;;  %2678 = vmatmul.mubr.msk.f32.vlgmr.msra.gmra.mrb[14].mxu1 %vm1350_vm2, %v698_v43 }
 0x10d   : > { %2682 = vmatprep.mubr.msk.f32.mxu0 %vm2915_vm0, %v2916_v11  ;;  %2687 = vmatprep.mubr.msk.f32.mxu1 %vm2915_vm0, %v2916_v11 }
 0x10e   : > { %v1135_v46 = vpop.f32.mrb[8].mxu0  ;;  %v1205_v49 = vpop.f32.mrb[8].mxu1 }
 0x10f   : > { %v1136_v47 = vadd.f32 %v2415_v44, %v1135_v46  ;;  %v2626_v48 = vpop.f32.mrb[9].mxu0  ;;  %v1206_v50 = vadd.f32 %v2416_v45, %v1205_v49  ;;  %v2637_v51 = vpop.f32.mrb[9].mxu1  ;;  %v1997_v44 = vld [vmem:[%s3425_s8 + $0x10] sm:$0xff]  ;;  %v1998_v49 = vld [vmem:[%s3425_s8 + $0x18] sm:$0xff] }
 0x111   : > { %2681 = vmatpush3.msra.mxu0 %v1136_v47  ;;  %2686 = vmatpush3.msra.mxu1 %v1206_v50 }
 0x112   : > { %2690 = vmatprep.subr.mxu0 %v2916_v11  ;;  %2695 = vmatprep.subr.mxu1 %v2916_v11 }
 0x116   : > { %v1275_v52 = vpop.f32.mrb[10].mxu0  ;;  %v1345_v53 = vpop.f32.mrb[10].mxu1 }
 0x117   : > { %v2648_v54 = vpop.f32.mrb[11].mxu0  ;;  %v2659_v55 = vpop.f32.mrb[11].mxu1  ;;  %v1276_v23 = vadd.f32 %v2417_v20, %v1275_v52  ;;  %v1346_v28 = vadd.f32 %v2418_v25, %v1345_v53 }
 0x1d7   : > { %v1423_v57 = vpop.f32.mrb[12].mxu0  ;;  %v1499_v59 = vpop.f32.mrb[12].mxu1 }
 0x1d8   : > { %v1424_v58 = vadd.f32 %v1423_v57, %v1349_v56  ;;  %v2664_v60 = vpop.f32.mrb[13].mxu0  ;;  %v2669_v61 = vpop.f32.mrb[13].mxu1  ;;  %v1500_v62 = vadd.f32 %v1499_v59, %v1349_v56 }
 0x1da   : > { %v1655_v63 = vsel %vm1350_vm2, %v1424_v58, -inf  ;;  %v1658_v0 = vsel %vm1350_vm2, %v1500_v62, -inf }
 0x1db   : > { %1656 = vmax.xlane.f32.xlu0 %v1655_v63 }
 0x1df   : > { %1659 = vmax.xlane.f32.xlu0 %v1658_v0  ;;  %v1575_v1 = vpop.f32.mrb[14].mxu0  ;;  %v1651_v2 = vpop.f32.mrb[14].mxu1 }
 0x1e0   : > { %v1576_v4 = vadd.f32 %v1575_v1, %v1349_v56  ;;  %v2674_v5 = vpop.f32.mrb[15].mxu0  ;;  %v2679_v6 = vpop.f32.mrb[15].mxu1  ;;  %v1652_v7 = vadd.f32 %v1651_v2, %v1349_v56 }
 0x1e2   : > { %v1661_v8 = vsel %vm1350_vm2, %v1576_v4, -inf  ;;  %v1664_v9 = vsel %vm1350_vm2, %v1652_v7, -inf }
 0x1e3   : > { %1662 = vmax.xlane.f32.xlu1 %v1661_v8 }
 0x1e7   : > { %1665 = vmax.xlane.f32.xlu1 %v1664_v9 }
 0x268   : > { %v1657_v10 = vpop.xlane.xlu0 %1656 }
 0x269   : > { %v1667_v12 = vsub.f32 %v1424_v58, %v1657_v10 }
 0x26b   : > { %v1671_v3 = vmul.f32 1.442695, %v1667_v12 }
 0x26c   : > { %v1660_v13 = vpop.xlane.xlu0 %1659 }
 0x26d   : > { %2834 = vpow2.f32 %v1671_v3  ;;  %v1668_v14 = vsub.f32 %v1500_v62, %v1660_v13 }
 0x26f   : > { %v1673_v15 = vmul.f32 1.442695, %v1668_v14 }
 0x270   : > { %v1663_v16 = vpop.xlane.xlu1 %1662 }
 0x271   : > { %2836 = vpow2.f32 %v1673_v15  ;;  %v1669_v17 = vsub.f32 %v1576_v4, %v1663_v16 }
 0x273   : > { %v1675_v19 = vmul.f32 1.442695, %v1669_v17 }
 0x274   : > { %v1666_v21 = vpop.xlane.xlu1 %1665 }
 0x275   : > { %2838 = vpow2.f32 %v1675_v19  ;;  %v1670_v18 = vsub.f32 %v1652_v7, %v1666_v21  ;;  %v2439_v7 = vld [vmem:[%s3426_s9] ss:$0 sm:$0xff] }
 0x277   : > { %v2835_v22 = vpop.eup %2834  ;;  %v1677_v24 = vmul.f32 1.442695, %v1670_v18 }
 0x278   : > { %2683 = vmatmul.mubr.msk.f32.vlgmr.msra.gmra.mrb[16].mxu0 %vm1350_vm2, %v2835_v22  ;;  %v1679_v26 = vsel %vm1350_vm2, %v2835_v22, 0.0 }
 0x279   : > { %2840 = vpow2.f32 %v1677_v24  ;;  %2691 = vmatpush3.msra.mxu0 %v1276_v23  ;;  %1680 = vadd.xlane.f32.xlu0 %v1679_v26 }
 0x27a   : > { %2692 = vmatprep.mubr.msk.f32.mxu0 %vm2915_vm0, %v2916_v11  ;;  %2700 = vmatprep.subr.mxu0 %v2916_v11 }
 0x27b   : > { %v2837_v27 = vpop.eup %2836 }
 0x27c   : > { %2688 = vmatmul.mubr.msk.f32.vlgmr.msra.gmra.mrb[16].mxu1 %vm1350_vm2, %v2837_v27  ;;  %v1682_v29 = vsel %vm1350_vm2, %v2837_v27, 0.0 }
 0x27d   : > { %2696 = vmatpush3.msra.mxu1 %v1346_v28  ;;  %1683 = vadd.xlane.f32.xlu1 %v1682_v29 }
 0x27e   : > { %2697 = vmatprep.mubr.msk.f32.mxu1 %vm2915_vm0, %v2916_v11  ;;  %2705 = vmatprep.subr.mxu1 %v2916_v11 }
 0x27f   : > { %v2839_v30 = vpop.eup %2838 }
 0x280   : > { %2693 = vmatmul.mubr.msk.f32.vlgmr.msra.gmra.mrb[18].mxu0 %vm1350_vm2, %v2839_v30  ;;  %v1685_v31 = vsel %vm1350_vm2, %v2839_v30, 0.0 }
 0x281   : > { %1686 = vadd.xlane.f32.xlu0 %v1685_v31  ;;  %2702 = vmatprep.mubr.msk.f32.mxu0 %vm2915_vm0, %v2916_v11 }
 0x282   : > { %2701 = vmatpush3.msra.mxu0 %v1995_v34 }
 0x283   : > { %v2841_v32 = vpop.eup %2840  ;;  %2710 = vmatprep.subr.mxu0 %v2916_v11 }
 0x284   : > { %2698 = vmatmul.mubr.msk.f32.vlgmr.msra.gmra.mrb[18].mxu1 %vm1350_vm2, %v2841_v32  ;;  %v1688_v33 = vsel %vm1350_vm2, %v2841_v32, 0.0 }
 0x285   : > { %1689 = vadd.xlane.f32.xlu1 %v1688_v33  ;;  %2707 = vmatprep.mubr.msk.f32.mxu1 %vm2915_vm0, %v2916_v11 }
 0x286   : > { %2706 = vmatpush3.msra.mxu1 %v1996_v35 }
 0x287   : > { %2715 = vmatprep.subr.mxu1 %v2916_v11 }
 0x306   : > { %v1681_v36 = vpop.xlane.xlu0 %1680 }
 0x307   : > { %2842 = vrcp.f32 %v1681_v36 }
 0x30a   : > { %v1684_v37 = vpop.xlane.xlu1 %1683 }
 0x30b   : > { %2844 = vrcp.f32 %v1684_v37 }
 0x30e   : > { %v1687_v38 = vpop.xlane.xlu0 %1686 }
 0x30f   : > { %2846 = vrcp.f32 %v1687_v38 }
 0x311   : > { %v2843_v40 = vpop.eup %2842 }
 0x312   : > { %v1690_v39 = vpop.xlane.xlu1 %1689 }
 0x313   : > { %2848 = vrcp.f32 %v1690_v39 }
 0x315   : > { %v2845_v45 = vpop.eup %2844 }
 0x319   : > { %v2847_v50 = vpop.eup %2846 }
 0x31d   : > { %v2849_v54 = vpop.eup %2848 }
 0x34b   : > { %v1768_v41 = vpop.f32.mrb[16].mxu0 }
 0x34c   : > { %v1991_v42 = vmul.f32 %v2843_v40, %v1768_v41  ;;  %v2684_v43 = vpop.f32.mrb[17].mxu0 }
 0x34e   : > { %2703 = vmatmul.mubr.msk.f32.vlgmr.msra.gmra.mrb[20].mxu0 %vm1350_vm2, %v1991_v42 }
 0x34f   : > { %v1841_v46 = vpop.f32.mrb[16].mxu1  ;;  %2711 = vmatpush3.msra.mxu0 %v1997_v44  ;;  %2712 = vmatprep.mubr.msk.f32.mxu0 %vm2915_vm0, %v2916_v11 }
 0x350   : > { %v1992_v47 = vmul.f32 %v2845_v45, %v1841_v46  ;;  %v2689_v48 = vpop.f32.mrb[17].mxu1 }
 0x352   : > { %2708 = vmatmul.mubr.msk.f32.vlgmr.msra.gmra.mrb[20].mxu1 %vm1350_vm2, %v1992_v47 }
 0x353   : > { %v1914_v51 = vpop.f32.mrb[18].mxu0  ;;  %2716 = vmatpush3.msra.mxu1 %v1998_v49  ;;  %2717 = vmatprep.mubr.msk.f32.mxu1 %vm2915_vm0, %v2916_v11 }
 0x354   : > { %v1993_v52 = vmul.f32 %v2847_v50, %v1914_v51  ;;  %v2694_v53 = vpop.f32.mrb[19].mxu0 }
 0x356   : > { %2713 = vmatmul.mubr.msk.f32.vlgmr.msra.gmra.mrb[22].mxu0 %vm1350_vm2, %v1993_v52 }
 0x357   : > { %v1987_v55 = vpop.f32.mrb[18].mxu1 }
 0x358   : > { %v1994_v56 = vmul.f32 %v2849_v54, %v1987_v55  ;;  %v2699_v57 = vpop.f32.mrb[19].mxu1 }
 0x35a   : > { %2718 = vmatmul.mubr.msk.f32.vlgmr.msra.gmra.mrb[22].mxu1 %vm1350_vm2, %v1994_v56 }
 0x421   : > { %v2068_v58 = vpop.f32.mrb[20].mxu0 }
 0x422   : > { %v2704_v59 = vpop.f32.mrb[21].mxu0  ;;  %v2291_v61 = vsel %vm417_vm1, %v2068_v58, 0.0 }
 0x425   : > { %v2141_v60 = vpop.f32.mrb[20].mxu1 }
 0x426   : > { %v2292_v62 = vsel %vm417_vm1, %v2141_v60, 0.0  ;;  %v2709_v11 = vpop.f32.mrb[21].mxu1 }
 0x427   : > { %v2293_v63 = vadd.f32 %v2292_v62, %v2291_v61 }
 0x429   : > { %v2214_v0 = vpop.f32.mrb[22].mxu0 }
 0x42a   : > { %v2294_v1 = vsel %vm417_vm1, %v2214_v0, 0.0  ;;  %v2714_v2 = vpop.f32.mrb[23].mxu0 }
 0x42b   : > { %v2295_v4 = vadd.f32 %v2294_v1, %v2293_v63 }
 0x42d   : > { %v2287_v5 = vpop.f32.mrb[22].mxu1 }
 0x42e   : > { %v2296_v6 = vsel %vm417_vm1, %v2287_v5, 0.0  ;;  %v2719_v8 = vpop.f32.mrb[23].mxu1 }
 0x42f   : > { %v2297_v9 = vadd.f32 %v2296_v6, %v2295_v4 }
 0x431   : > { %v2305_v10 = vadd.f32 %v2439_v7, %v2297_v9 }
 0x433   : > { %2306 = vst.msk [vmem:[%s363_s29] sm:$0xff] %vm417_vm1, %v2305_v10 }
 0x434   : > { %2863 = shalt.err (!%p2860_p3)
}
 0x435   : > { %s2864_s30 = scalar_lea.hbm %s3374_s20, 128  ;;  %s2868_s29 = scalar_lea.hbm %s3427_s10, 256 }
 0x436   : > { %p2865_p4 = scmp.ne.s32.totalorder %s3374_s20, %s2864_s30  ;;  %p2869_p9 = scmp.lt.u32.totalorder %s3374_s20, %s3427_s10 }
 0x437   : > { %p2870_p10 = scmp.lt.u32.totalorder %s2868_s29, %s2864_s30  ;;  %p2872_p12 = scmp.lt.u32.totalorder %s2864_s30, %s3374_s20 }
 0x438   : > { %p2866_p7 = pnand %p2865_p4, %p3011_p5 }
 0x439   : > { %p2871_p11 = por %p2870_p10, %p2869_p9 }
 0x43a   : > { %p2867_p8 = pneg %p2866_p7 }
 0x43b   : > { %p2873_p13 = por %p2872_p12, %p2871_p11 }
 0x43d   : > { %p2874_p0 = pnand %p2873_p13, %p2867_p8 }
 0x43f   : > { %2877 = shalt.err (!%p2874_p0)
}
 0x440   : > { %2792 = dma.vmem_to_hbm [thread:$0]  (%p3011_p5), %s3376_s11, 128, %s3374_s20, %s2308_s25  }
 0x441 PF: > { %p2798_p1 = scmp.ge.s32.totalorder %s2912_s16, 2  ;;  %s2333_s22 = sand.u32 1, %s2900_s13  }
 0x442   : > { %s2334_s17 = scalar_lea.sflag [#allocation3], %s2333_s22 }
 0x443   : > { %p2795_p2 = pnand %p2798_p1, %p3015_p6 }
 0x445   : > { %2895 = dma.done.wait (!%p2795_p2), %s2334_s17, 128  }
 0x446   : > { %2897 = vsyncadd (!%p2795_p2), %s2334_s17, 4294967168  ;;  %s3431_s21 = sld [smem:[#allocation5_spill]]  ;;  %p20_p3 = scmp.ge.s32.totalorder %s2998_s19, 4  }
 0x447   : > { %s3432_s13 = smov %s2904_s14  ;;  %s3433_s14 = smov %s2908_s15 }
 0x448   : > { %s3435_s16 = smov %s2998_s19  ;;  %22 = sbr.rel (!%p20_p3) target bundleno = 3 (0x3), region = 98 }
 0x44c   : > { %s3434_s15 = smov %s3431_s21 }
 0x44f   :  { %2339 = vsyncpa [#allocation3], 1 }
 0x450   :  { %2341 = vsyncpa [#allocation3 + $0x1], 1 }

</bundles_post_ra>
